<compile_context>
chip_gen: v6e
topology: v6e:2x2x1
jax: 0.10.0
libtpu: 0.0.40
codegen_flags: <defaults>
</compile_context>

<pallas_src>
import functools

import jax
import jax.numpy as jnp
from jax.experimental import pallas as pl
from jax.experimental.pallas import tpu as pltpu

LANES = 128
ACC_ROWS = 8                          # sublane height of the vreg accumulators
TARGET_STEP_BYTES = 4 * 1024 * 1024   # HBM bytes per grid step (both inputs)

_SUBLANE_ALIGN = {1: 32, 2: 16, 4: 8, 8: 8}   # itemsize -> row alignment


def _dice_partial_kernel(p_ref, t_ref, inter_ref, denom_ref, *,
                         nbps, valid_rows, needs_mask):
    """Accumulate sum(p*t) and sum(p+t) into resident (1, 8, 128) output blocks."""
    b = pl.program_id(1)  # reduction ("arbitrary") axis

    @pl.when(b == 0)
    def _():
        inter_ref[...] = jnp.zeros_like(inter_ref)
        denom_ref[...] = jnp.zeros_like(denom_ref)

    p = p_ref[...].astype(jnp.float32)
    t = t_ref[...].astype(jnp.float32)
    pt = p * t
    ps = p + t

    block_rows = p_ref.shape[0]
    if needs_mask:
        # Zero the contribution of rows past the logical extent: the partial
        # last block and any phantom block introduced by the 2-way split.
        s = pl.program_id(0)
        row_start = (s * nbps + b) * block_rows
        row_ids = jax.lax.broadcasted_iota(jnp.int32, pt.shape, 0) + row_start
        valid = row_ids < valid_rows
        pt = jnp.where(valid, pt, 0.0)
        ps = jnp.where(valid, ps, 0.0)

    groups = block_rows // ACC_ROWS
    # Reduce over the major axis only -> pure elementwise VPU adds; the final
    # cross-lane/sublane reduce happens outside on a tiny (splits, 8, 128) array.
    inter_ref[...] += jnp.sum(pt.reshape(groups, ACC_ROWS, LANES), axis=0, keepdims=True)
    denom_ref[...] += jnp.sum(ps.reshape(groups, ACC_ROWS, LANES), axis=0, keepdims=True)


def dice_loss(preds, targets, smooth=1.0):
    """Binary Dice loss, matching the PyTorch DiceLoss.forward semantics."""
    smooth = float(smooth)

    pf = jnp.ravel(preds)
    tf = jnp.ravel(targets)
    # bool masks: store as int8 (same width); kernel casts to f32 internally.
    if pf.dtype == jnp.bool_:
        pf = pf.astype(jnp.int8)
    if tf.dtype == jnp.bool_:
        tf = tf.astype(jnp.int8)

    n = pf.shape[0]
    rows = n // LANES
    n_lane = rows * LANES

    p_item = pf.dtype.itemsize
    t_item = tf.dtype.itemsize
    align = max(_SUBLANE_ALIGN.get(p_item, 8), _SUBLANE_ALIGN.get(t_item, 8), ACC_ROWS)

    if rows < align:
        # Tiny input: not worth a kernel launch; pure-JAX path.
        p32 = pf.astype(jnp.float32)
        t32 = tf.astype(jnp.float32)
        inter = jnp.sum(p32 * t32)
        denom = jnp.sum(p32) + jnp.sum(t32)
        return 1.0 - (2.0 * inter + smooth) / (denom + smooth)

    # dtype-aware block size: ~TARGET_STEP_BYTES of HBM traffic per grid step,
    # rows kept a multiple of the packed-sublane tiling for the input dtypes.
    bytes_per_row = LANES * (p_item + t_item)
    block_rows = (TARGET_STEP_BYTES // bytes_per_row) // align * align
    block_rows = max(align, min(block_rows, (rows // align) * align))

    nb_total = pl.cdiv(rows, block_rows)
    # Unconditional 2-way split so both v7x TensorCores stream half the rows;
    # harmless (sequential) on v5e/v6e.
    splits = 2 if nb_total >= 2 else 1
    nbps = pl.cdiv(nb_total, splits)
    needs_clamp = splits * nbps != nb_total          # phantom block on the 2nd split
    needs_mask = (rows % block_rows != 0) or needs_clamp

    if n_lane != n:
        # TODO(synk): a non-lane-aligned total size forces a prefix slice that XLA
        # may materialize; typical NCHW segmentation sizes (n % 128 == 0) avoid it.
        p_k = pf[:n_lane]
        t_k = tf[:n_lane]
    else:
        p_k, t_k = pf, tf
    p2 = p_k.reshape(rows, LANES)
    t2 = t_k.reshape(rows, LANES)

    if needs_clamp:
        last = nb_total - 1
        in_idx = lambda s, b: (jnp.minimum(s * nbps + b, last), 0)
    else:
        in_idx = lambda s, b: (s * nbps + b, 0)
    out_idx = lambda s, b: (s, 0, 0)

    bytes_accessed = n_lane * (p_item + t_item) + 2 * splits * ACC_ROWS * LANES * 4
    cost = pl.CostEstimate(flops=4 * n_lane, transcendentals=0,
                           bytes_accessed=bytes_accessed)

    kernel = functools.partial(_dice_partial_kernel, nbps=nbps,
                               valid_rows=rows, needs_mask=needs_mask)

    inter_part, denom_part = pl.pallas_call(
        kernel,
        out_shape=(
            jax.ShapeDtypeStruct((splits, ACC_ROWS, LANES), jnp.float32),
            jax.ShapeDtypeStruct((splits, ACC_ROWS, LANES), jnp.float32),
        ),
        grid_spec=pltpu.PrefetchScalarGridSpec(
            num_scalar_prefetch=0,
            grid=(splits, nbps),
            in_specs=[
                pl.BlockSpec((block_rows, LANES), in_idx),
                pl.BlockSpec((block_rows, LANES), in_idx),
            ],
            out_specs=[
                pl.BlockSpec((1, ACC_ROWS, LANES), out_idx),
                pl.BlockSpec((1, ACC_ROWS, LANES), out_idx),
            ],
        ),
        compiler_params=pltpu.CompilerParams(
            dimension_semantics=("parallel", "arbitrary"),
        ),
        cost_estimate=cost,
    )(p2, t2)

    inter = jnp.sum(inter_part)
    denom = jnp.sum(denom_part)

    if n_lane != n:
        # Sub-lane tail (< 128 elements): plain jnp reduce.
        tp = pf[n_lane:].astype(jnp.float32)
        tt = tf[n_lane:].astype(jnp.float32)
        inter = inter + jnp.sum(tp * tt)
        denom = denom + jnp.sum(tp) + jnp.sum(tt)

    return 1.0 - (2.0 * inter + smooth) / (denom + smooth)


def _reference(preds, targets, smooth=1.0):
    pf = preds.reshape(-1).astype(jnp.float32)
    tf = targets.reshape(-1).astype(jnp.float32)
    inter = jnp.sum(pf * tf)
    return 1.0 - (2.0 * inter + smooth) / (jnp.sum(pf) + jnp.sum(tf) + smooth)


if __name__ == "__main__":
    key = jax.random.PRNGKey(0)
    kp, kt, kp2, kt2 = jax.random.split(key, 4)

    # Shapes consistent with a segmentation forward: NCHW (B=2, C=4, H=16, W=16).
    preds = jax.nn.sigmoid(jax.random.normal(kp, (2, 4, 16, 16), dtype=jnp.float32))
    targets = (jax.random.uniform(kt, (2, 4, 16, 16)) > 0.5).astype(jnp.float32)

    loss = jax.block_until_ready(dice_loss(preds, targets, smooth=1.0))
    ref = _reference(preds, targets, smooth=1.0)
    assert jnp.allclose(loss, ref, atol=1e-5, rtol=1e-5), (loss, ref)

    # Irregular size: exercises partial-block masking, the 2-way split, and the
    # sub-128 lane tail (n = 2*3*17*19 = 1938).
    preds2 = jax.nn.sigmoid(jax.random.normal(kp2, (2, 3, 17, 19), dtype=jnp.float32))
    targets2 = (jax.random.uniform(kt2, (2, 3, 17, 19)) > 0.5).astype(jnp.float32)

    loss2 = jax.block_until_ready(dice_loss(preds2, targets2, smooth=1.0))
    ref2 = _reference(preds2, targets2, smooth=1.0)
    assert jnp.allclose(loss2, ref2, atol=1e-5, rtol=1e-5), (loss2, ref2)

    print("KERNEL_OK")
</pallas_src>

<mosaic_0001>
module attributes {stable_mosaic.version = 11 : i64} {
  func.func @_dice_partial_kernel(%arg0: i32, %arg1: i32, %arg2: memref<16x128xf32, #tpu.memory_space<vmem>>, %arg3: memref<16x128xf32, #tpu.memory_space<vmem>>, %arg4: memref<1x8x128xf32, #tpu.memory_space<vmem>>, %arg5: memref<1x8x128xf32, #tpu.memory_space<vmem>>) attributes {dimension_semantics = [#tpu.dimension_semantics<parallel>, #tpu.dimension_semantics<arbitrary>], iteration_bounds = array<i64: 1, 1>, scalar_prefetch = 0 : i64, scratch_operands = 0 : i64, tpu.core_type = #tpu.core_type<tc>, window_params = [{transform_indices = @transform_0, window_bounds = array<i64: 16, 128>}, {transform_indices = @transform_1, window_bounds = array<i64: 16, 128>}, {transform_indices = @transform_2, window_bounds = array<i64: 1, 8, 128>}, {transform_indices = @transform_3, window_bounds = array<i64: 1, 8, 128>}]} {
    %c0_i32 = arith.constant 0 : i32
    %0 = arith.cmpi eq, %arg1, %c0_i32 : i32
    %1 = arith.extui %0 : i1 to i32
    %c0_i32_0 = arith.constant 0 : i32
    %2 = arith.cmpi ne, %1, %c0_i32_0 : i32
    scf.if %2 {
      %cst_17 = arith.constant 0.000000e+00 : f32
      %19 = vector.broadcast %cst_17 : f32 to vector<1x8x128xf32>
      %c0_18 = arith.constant 0 : index
      %c0_19 = arith.constant 0 : index
      %c0_20 = arith.constant 0 : index
      %20 = vector.load %arg4[%c0_18, %c0_19, %c0_20] : memref<1x8x128xf32, #tpu.memory_space<vmem>>, vector<1x8x128xf32>
      tpu.vector_store %arg4[%c0_18, %c0_19, %c0_20], %19 {strides = array<i32>} : memref<1x8x128xf32, #tpu.memory_space<vmem>>, vector<1x8x128xf32>,
      %cst_21 = arith.constant 0.000000e+00 : f32
      %21 = vector.broadcast %cst_21 : f32 to vector<1x8x128xf32>
      %c0_22 = arith.constant 0 : index
      %c0_23 = arith.constant 0 : index
      %c0_24 = arith.constant 0 : index
      %22 = vector.load %arg5[%c0_22, %c0_23, %c0_24] : memref<1x8x128xf32, #tpu.memory_space<vmem>>, vector<1x8x128xf32>
      tpu.vector_store %arg5[%c0_22, %c0_23, %c0_24], %21 {strides = array<i32>} : memref<1x8x128xf32, #tpu.memory_space<vmem>>, vector<1x8x128xf32>,
    } else {
    }
    %c0 = arith.constant 0 : index
    %c0_1 = arith.constant 0 : index
    %3 = vector.load %arg2[%c0, %c0_1] : memref<16x128xf32, #tpu.memory_space<vmem>>, vector<16x128xf32>
    %c0_2 = arith.constant 0 : index
    %c0_3 = arith.constant 0 : index
    %4 = vector.load %arg3[%c0_2, %c0_3] : memref<16x128xf32, #tpu.memory_space<vmem>>, vector<16x128xf32>
    %5 = arith.mulf %3, %4 : vector<16x128xf32>
    %6 = arith.addf %3, %4 : vector<16x128xf32>
    %c0_4 = arith.constant 0 : index
    %c0_5 = arith.constant 0 : index
    %c0_6 = arith.constant 0 : index
    %7 = vector.load %arg4[%c0_4, %c0_5, %c0_6] : memref<1x8x128xf32, #tpu.memory_space<vmem>>, vector<1x8x128xf32>
    %8 = vector.shape_cast %5 : vector<16x128xf32> to vector<2x8x128xf32>
    %cst = arith.constant dense<0.000000e+00> : vector<8x128xf32>
    %9 = vector.multi_reduction <add>, %8, %cst [0] : vector<2x8x128xf32> to vector<8x128xf32>
    %10 = vector.shape_cast %9 : vector<8x128xf32> to vector<1x8x128xf32>
    %11 = arith.addf %7, %10 : vector<1x8x128xf32>
    %c0_7 = arith.constant 0 : index
    %c0_8 = arith.constant 0 : index
    %c0_9 = arith.constant 0 : index
    %12 = vector.load %arg4[%c0_7, %c0_8, %c0_9] : memref<1x8x128xf32, #tpu.memory_space<vmem>>, vector<1x8x128xf32>
    tpu.vector_store %arg4[%c0_7, %c0_8, %c0_9], %11 {strides = array<i32>} : memref<1x8x128xf32, #tpu.memory_space<vmem>>, vector<1x8x128xf32>,
    %c0_10 = arith.constant 0 : index
    %c0_11 = arith.constant 0 : index
    %c0_12 = arith.constant 0 : index
    %13 = vector.load %arg5[%c0_10, %c0_11, %c0_12] : memref<1x8x128xf32, #tpu.memory_space<vmem>>, vector<1x8x128xf32>
    %14 = vector.shape_cast %6 : vector<16x128xf32> to vector<2x8x128xf32>
    %cst_13 = arith.constant dense<0.000000e+00> : vector<8x128xf32>
    %15 = vector.multi_reduction <add>, %14, %cst_13 [0] : vector<2x8x128xf32> to vector<8x128xf32>
    %16 = vector.shape_cast %15 : vector<8x128xf32> to vector<1x8x128xf32>
    %17 = arith.addf %13, %16 : vector<1x8x128xf32>
    %c0_14 = arith.constant 0 : index
    %c0_15 = arith.constant 0 : index
    %c0_16 = arith.constant 0 : index
    %18 = vector.load %arg5[%c0_14, %c0_15, %c0_16] : memref<1x8x128xf32, #tpu.memory_space<vmem>>, vector<1x8x128xf32>
    tpu.vector_store %arg5[%c0_14, %c0_15, %c0_16], %17 {strides = array<i32>} : memref<1x8x128xf32, #tpu.memory_space<vmem>>, vector<1x8x128xf32>,
    return
  }
  func.func @transform_0(%arg0: i32, %arg1: i32) -> (i32, i32) {
    %c1_i32 = arith.constant 1 : i32
    %0 = arith.muli %arg0, %c1_i32 : i32
    %1 = arith.addi %0, %arg1 : i32
    %c0_i32 = arith.constant 0 : i32
    %c0_i32_0 = arith.constant 0 : i32
    return %1, %c0_i32 : i32, i32
  }
  func.func @transform_1(%arg0: i32, %arg1: i32) -> (i32, i32) {
    %c1_i32 = arith.constant 1 : i32
    %0 = arith.muli %arg0, %c1_i32 : i32
    %1 = arith.addi %0, %arg1 : i32
    %c0_i32 = arith.constant 0 : i32
    %c0_i32_0 = arith.constant 0 : i32
    return %1, %c0_i32 : i32, i32
  }
  func.func @transform_2(%arg0: i32, %arg1: i32) -> (i32, i32, i32) {
    %c0_i32 = arith.constant 0 : i32
    %c0_i32_0 = arith.constant 0 : i32
    %c0_i32_1 = arith.constant 0 : i32
    return %arg0, %c0_i32, %c0_i32_0 : i32, i32, i32
  }
  func.func @transform_3(%arg0: i32, %arg1: i32) -> (i32, i32, i32) {
    %c0_i32 = arith.constant 0 : i32
    %c0_i32_0 = arith.constant 0 : i32
    %c0_i32_1 = arith.constant 0 : i32
    return %arg0, %c0_i32, %c0_i32_0 : i32, i32, i32
  }
}

</mosaic_0001>

<bundles_post_ra>
// kernel: tpu_custom_call.1
= control target key start
LH: loop header
LB: loop body
LE: loop exit
PB: predicated region body
PF: predicated region fallthrough
CT: control target
= control target key end

     0   :  { %9 = vsyncpa [#allocation3], 0  ;;  %s240_s0 = inlined_call_operand.hbm [shape: f32[16,128], index: 0, kind: input, shape index: {}]   ;;  %s241_s1 = inlined_call_operand.hbm [shape: f32[16,128], index: 1, kind: input, shape index: {}]   ;;  %s242_s2 = inlined_call_operand.hbm [shape: f32[1,8,128], index: 2, kind: output, shape index: {0}]   ;;  %s243_s3 = inlined_call_operand.hbm [shape: f32[1,8,128], index: 3, kind: output, shape index: {1}]  }
   0x1   :  { %10 = vsyncpa [#allocation6], 0 }
   0x2   :  { %11 = vsyncpa [#allocation4], 0 }
   0x3   :  { %12 = vsyncpa [#allocation9], 0  ;;  %s202_s12 = smov [#allocation2]  }
   0x4   :  { %s22_s13 = sshll.u32 %s202_s12, 4  ;;  %s23_s13 = int_to_ptr.vmem [resolvable:$true] %s22_s13 }
   0x5   :  { %s122_s14 = scalar_lea.vmem %s23_s13, 256  ;;  %p127_p1 = scmp.lt.s32.totalorder %s23_s13, %s23_s13 }
   0x6   :  { %p123_p0 = scmp.ne.s32.totalorder %s23_s13, %s122_s14  ;;  %p128_p2 = scmp.lt.s32.totalorder %s122_s14, %s122_s14 }
   0x8   :  { %p129_p3 = por %p128_p2, %p127_p1 }
   0xa   :  { %p130_p4 = pnand %p129_p3, %p123_p0 }
   0xc   :  { %133 = shalt.err (!%p130_p4)
}
   0xd   :  { %s203_s15 = smov 128   ;;  %s204_s16 = smov 8  }
   0xe   :  { %28 = dma.hbm_to_vmem [thread:$0]  %s240_s0, 256, %s23_s13, [#allocation3], %s203_s15, %s203_s15, %s204_s16  }
   0xf   :  { %s205_s19 = smov [#allocation5]  }
  0x10   :  { %s38_s20 = sshll.u32 %s205_s19, 4  ;;  %s39_s20 = int_to_ptr.vmem [resolvable:$true] %s38_s20 }
  0x11   :  { %s142_s21 = scalar_lea.vmem %s39_s20, 256  ;;  %p147_p6 = scmp.lt.s32.totalorder %s39_s20, %s39_s20 }
  0x12   :  { %p143_p5 = scmp.ne.s32.totalorder %s39_s20, %s142_s21  ;;  %p148_p7 = scmp.lt.s32.totalorder %s142_s21, %s142_s21 }
  0x14   :  { %p149_p8 = por %p148_p7, %p147_p6 }
  0x16   :  { %p150_p9 = pnand %p149_p8, %p143_p5 }
  0x18   :  { %153 = shalt.err (!%p150_p9)
}
  0x19   :  { %44 = dma.hbm_to_vmem [thread:$0]  %s241_s1, 256, %s39_s20, [#allocation6], %s203_s15, %s203_s15, %s204_s16  }
  0x1a   :  { %194 = dma.done.wait [#allocation3], 256  }
  0x1b   :  { %195 = vsyncadd [#allocation3], 4294967040 }
  0x1c   :  { %196 = dma.done.wait [#allocation6], 256  }
  0x1d   :  { %197 = vsyncadd [#allocation6], 4294967040  ;;  %v61_v0 = vld [vmem:[#allocation2] sm:$0xff]  ;;  %v62_v1 = vld [vmem:[#allocation2 + $0x8] sm:$0xff]  ;;  %s206_s0 = smov [#allocation7]   ;;  %s207_s25 = smov [#allocation8]  }
  0x1e   :  { %v63_v2 = vld [vmem:[#allocation5] sm:$0xff]  ;;  %v64_v3 = vld [vmem:[#allocation5 + $0x8] sm:$0xff]  ;;  %s83_s24 = sshll.u32 %s206_s0, 4  ;;  %s93_s26 = sshll.u32 %s207_s25, 4  ;;  %s84_s24 = int_to_ptr.vmem [resolvable:$true] %s83_s24  ;;  %s94_s26 = int_to_ptr.vmem [resolvable:$true] %s93_s26 }
  0x1f   :  { %v65_v4 = vmul.f32 %v63_v2, %v61_v0  ;;  %v67_v5 = vadd.f32 %v63_v2, %v61_v0  ;;  %v66_v6 = vmul.f32 %v64_v3, %v62_v1  ;;  %v68_v7 = vadd.f32 %v64_v3, %v62_v1  ;;  %s154_s1 = scalar_lea.vmem %s84_s24, 128  ;;  %p159_p11 = scmp.lt.s32.totalorder %s84_s24, %s84_s24 }
  0x20   :  { %p155_p10 = scmp.ne.s32.totalorder %s84_s24, %s154_s1  ;;  %p160_p12 = scmp.lt.s32.totalorder %s154_s1, %s154_s1 }
  0x21   :  { %v70_v8 = vadd.f32 %v66_v6, %v65_v4  ;;  %v74_v9 = vadd.f32 %v68_v7, %v67_v5 }
  0x22   :  { %p161_p13 = por %p160_p12, %p159_p11 }
  0x23   :  { %72 = vst [vmem:[#allocation7] sm:$0xff] %v70_v8  ;;  %76 = vst [vmem:[#allocation8] sm:$0xff] %v74_v9 }
  0x24   :  { %p162_p0 = pnand %p161_p13, %p155_p10 }
  0x26   :  { %165 = shalt.err (!%p162_p0)
}
  0x27   :  { %86 = dma.vmem_to_hbm [thread:$0]  %s84_s24, 128, %s242_s2, [#allocation4]  }
  0x28   :  { %s174_s29 = scalar_lea.vmem %s94_s26, 128  ;;  %p179_p2 = scmp.lt.s32.totalorder %s94_s26, %s94_s26 }
  0x29   :  { %p175_p1 = scmp.ne.s32.totalorder %s94_s26, %s174_s29  ;;  %p180_p3 = scmp.lt.s32.totalorder %s174_s29, %s174_s29 }
  0x2b   :  { %p181_p4 = por %p180_p3, %p179_p2 }
  0x2d   :  { %p182_p5 = pnand %p181_p4, %p175_p1 }
  0x2f   :  { %185 = shalt.err (!%p182_p5)
}
  0x30   :  { %96 = dma.vmem_to_hbm [thread:$0]  %s94_s26, 128, %s243_s3, [#allocation9]  }
  0x31   :  { %198 = dma.done.wait [#allocation4], 128  }
  0x32   :  { %199 = vsyncadd [#allocation4], 4294967168 }
  0x33   :  { %200 = dma.done.wait [#allocation9], 128  }
  0x34   :  { %201 = vsyncadd [#allocation9], 4294967168 }
  0x35   :  { %103 = vsyncpa [#allocation3], 1 }
  0x36   :  { %104 = vsyncpa [#allocation6], 1 }
  0x37   :  { %105 = vsyncpa [#allocation4], 1 }
  0x38   :  { %106 = vsyncpa [#allocation9], 1 }

</bundles_post_ra>
